<compile_context>
chip_gen: v6e
topology: v6e:2x2x1
jax: 0.10.0
libtpu: 0.0.40
codegen_flags: <defaults>
</compile_context>

<pallas_src>
import functools

import jax
import jax.numpy as jnp
from jax import lax
from jax.experimental import pallas as pl
from jax.experimental.pallas import tpu as pltpu

NEG_INF = -1e9     # masked attention score
NEG_BIG = -1e30    # bias for padded logit lanes (exp underflows to exactly 0)


# ----------------------------------------------------------------------------- kernel
def main_block_kernel(s_na_ref, bid_na_ref, pad_na_ref,
                      s_aa_ref, bid_aa_ref,
                      wq_ref, wk_ref, wv_ref, wo_ref,
                      w1_ref, b1_ref, w2_ref, b2_ref,
                      wout_ref, bout_ref,
                      out_ref, *, vocab):
    f32 = jnp.float32
    bf16 = jnp.bfloat16

    s_na = s_na_ref[...]                                    # (TM, D)  bf16
    s_aa = s_aa_ref[...]                                    # (BA, D)  bf16 (VMEM-resident)

    # ---- NA -> AA cross attention (1/sqrt(D) already folded into wq) ----
    q = jnp.dot(s_na, wq_ref[...], preferred_element_type=f32)      # (TM, D) f32
    k = jnp.dot(s_aa, wk_ref[...], preferred_element_type=f32)      # (BA, D) f32
    v = jnp.dot(s_aa, wv_ref[...], preferred_element_type=f32)      # (BA, D) f32

    # q @ k^T without an explicit transpose; bf16 MXU inputs, f32 accumulate.
    scores = lax.dot_general(q.astype(bf16), k.astype(bf16),
                             (((1,), (1,)), ((), ())),
                             preferred_element_type=f32)            # (TM, BA)

    # In-kernel block-diagonal mask: an NA row only attends to AA rows of the same
    # batch element; invalid (padded) AA rows carry batch id -1 so they never match.
    same = bid_na_ref[...] == bid_aa_ref[...]                        # (TM,1)==(1,BA)->(TM,BA)
    scores = jnp.where(same, scores, NEG_INF)

    m = jnp.max(scores, axis=-1, keepdims=True)
    p = jnp.exp(scores - m)
    denom = jnp.maximum(jnp.sum(p, axis=-1, keepdims=True), 1e-30)   # guard all-masked rows
    attn = jnp.dot(p.astype(bf16), v.astype(bf16),
                   preferred_element_type=f32)                       # (TM, D) un-normalized
    attn = attn * pl.reciprocal(denom, approx=True)                  # normalize AFTER PV: (TM,D)

    h = s_na.astype(f32) + jnp.dot(attn.astype(bf16), wo_ref[...],
                                   preferred_element_type=f32)

    # ---- MLP with residual ----
    ff = jnp.dot(h.astype(bf16), w1_ref[...], preferred_element_type=f32) + b1_ref[...]
    # TODO(synk): PyTorch nn.GELU defaults to exact erf; tanh approximation kept here.
    ff = jax.nn.gelu(ff, approximate=True)
    ff = jnp.dot(ff.astype(bf16), w2_ref[...], preferred_element_type=f32) + b2_ref[...]
    h = (h + ff) * pad_na_ref[...]                                   # zero padded NA rows

    # ---- output projection (lane-padded to 128) + fused log_softmax ----
    # Padded logit lanes have bias -1e30 -> contribute exactly 0 to the log-sum-exp.
    logits = jnp.dot(h.astype(bf16), wout_ref[...],
                     preferred_element_type=f32) + bout_ref[...]     # (TM, OUT_W)
    lmax = jnp.max(logits, axis=-1, keepdims=True)
    lse = jnp.log(jnp.sum(jnp.exp(logits - lmax), axis=-1, keepdims=True)) + lmax
    log_probs = logits - lse

    # Single lane-dense output slab: lanes [0, vocab) = log_probs, lane vocab = lse.
    lane = lax.broadcasted_iota(jnp.int32, log_probs.shape, 1)
    out_ref[...] = jnp.where(lane == vocab, lse, log_probs).astype(out_ref.dtype)


# ----------------------------------------------------------------------------- param prep
def prepare_params(params):
    """One-time packing of parameters into kernel-ready operands (hoisted out of forward)."""
    bf16 = jnp.bfloat16
    D = params['wq'].shape[0]
    V = params['w_out'].shape[-1]
    out_w = max(128, pl.cdiv(V + 1, 128) * 128)        # log_probs + lse, lane-dense

    w_out_p = jnp.zeros((D, out_w), jnp.float32).at[:, :V].set(params['w_out'])
    b_out_p = jnp.full((1, out_w), NEG_BIG, jnp.float32).at[:, :V].set(params['b_out'])

    return {
        # embedder tables / projections (plain-JAX glue)
        'embed_na': params['embed_na'],
        'embed_aa': params['embed_aa'],
        'embed_ct': params['embed_ct'],
        'w_t': params['w_t'],
        # kernel operands: bf16 matmul inputs, scale folded into wq, 128-padded output proj
        'wq': (params['wq'] / jnp.sqrt(jnp.float32(D))).astype(bf16),
        'wk': params['wk'].astype(bf16),
        'wv': params['wv'].astype(bf16),
        'wo': params['wo'].astype(bf16),
        'w1': params['w1'].astype(bf16),
        'b1': params['b1'].astype(jnp.float32),
        'w2': params['w2'].astype(bf16),
        'b2': params['b2'].astype(jnp.float32),
        'w_out_p': w_out_p.astype(bf16),
        'b_out_p': b_out_p,
        'vocab': V,
        'out_w': out_w,
    }


def _row_tile(bn_rows):
    """Row tile size: large to amortize ~0.35us/step overhead, multiple of 8, and >=2 tiles
    whenever possible so a v7x megacore can shard the 'parallel' axis across its 2 TCs."""
    if bn_rows >= 512:
        return 256
    half = (bn_rows + 1) // 2
    return max(8, ((half + 7) // 8) * 8)


# ----------------------------------------------------------------------------- wrapper
def main_network_forward(prepped, input_feats):
    f32, bf16 = jnp.float32, jnp.bfloat16

    # ---- Embedder (glue, plain JAX): table lookups + T_aa translation projection ----
    s_na = (prepped['embed_na'][input_feats['tidx_na']]
            + prepped['embed_ct'][input_feats['ct_na']]).astype(f32)       # (B, N_na, D)
    s_aa = (prepped['embed_aa'][input_feats['ridx_aa']]
            + jnp.einsum('bnt,td->bnd', input_feats['T_aa'].astype(f32),
                         prepped['w_t'])).astype(f32)                      # (B, N_aa, D)
    # TODO(synk): only the translation component of the SE(3) frames T_aa is embedded;
    # the rotation features used by the real Embedder/MainBlock are not reproduced.

    B, N_na, D = s_na.shape
    N_aa = s_aa.shape[1]
    V, OUT_W = prepped['vocab'], prepped['out_w']
    Dff = prepped['w1'].shape[-1]
    BN, BA = B * N_na, B * N_aa

    TM = _row_tile(BN)
    n_tiles = pl.cdiv(BN, TM)
    BN_pad = n_tiles * TM

    # Row-side operands (batch folded into rows; padded up to a TM multiple).
    s_na_flat = jnp.zeros((BN_pad, D), bf16).at[:BN].set(s_na.reshape(BN, D).astype(bf16))
    pad_na = jnp.zeros((BN_pad, 1), f32).at[:BN].set(
        input_feats['pad_na'].astype(f32).reshape(BN, 1))
    bid_na = jnp.full((BN_pad, 1), -2, jnp.int32).at[:BN, 0].set(
        jnp.repeat(jnp.arange(B, dtype=jnp.int32), N_na))

    # AA-side operands (whole-array, VMEM-resident across all grid steps).
    # Invalid AA rows get batch id -1 -> mask is built in-kernel, no O(BN*BA) bias DMA.
    s_aa_flat = s_aa.reshape(BA, D).astype(bf16)
    bid_aa = jnp.where(input_feats['pad_aa'].reshape(BA) > 0.5,
                       jnp.repeat(jnp.arange(B, dtype=jnp.int32), N_aa),
                       -1).reshape(1, BA).astype(jnp.int32)

    # BlockSpecs: row-tiled activations, constant index_maps keep weights VMEM-resident.
    def whole(arr):
        return pl.BlockSpec(arr.shape, lambda i: (0,) * arr.ndim)

    def row(width):
        return pl.BlockSpec((TM, width), lambda i: (i, 0))

    in_specs = [
        row(D),                    # s_na
        row(1),                    # bid_na
        row(1),                    # pad_na
        whole(s_aa_flat),          # s_aa
        whole(bid_aa),             # bid_aa
        whole(prepped['wq']), whole(prepped['wk']), whole(prepped['wv']),
        whole(prepped['wo']),
        whole(prepped['w1']), whole(prepped['b1']),
        whole(prepped['w2']), whole(prepped['b2']),
        whole(prepped['w_out_p']), whole(prepped['b_out_p']),
    ]
    out_spec = pl.BlockSpec((TM, OUT_W), lambda i: (i, 0))

    # Cost estimate (lets XLA schedule the embedder gathers around the call).
    flops = 2 * (BN_pad * D * D
                 + n_tiles * 2 * BA * D * D
                 + 2 * BN_pad * BA * D
                 + BN_pad * D * D
                 + BN_pad * D * Dff + BN_pad * Dff * D
                 + BN_pad * D * OUT_W)
    bytes_accessed = (2 * (BN_pad * D + BA * D
                           + 4 * D * D + D * Dff + Dff * D + D * OUT_W)
                      + 4 * (Dff + D + OUT_W)
                      + 4 * (2 * BN_pad + BA)
                      + 4 * BN_pad * OUT_W)
    cost = pl.CostEstimate(flops=flops,
                           transcendentals=BN_pad * (BA + Dff + OUT_W + 1),
                           bytes_accessed=bytes_accessed)

    # Explicit VMEM budget (safe for v7x's 64 MiB physical / 32 MiB scoped default).
    bytes_resident = (2 * (BA * D + 4 * D * D + D * Dff + Dff * D + D * OUT_W)
                      + 4 * (BA + Dff + D + OUT_W))
    bytes_per_tile = (2 * (2 * TM * D + 8 * TM)            # double-buffered row inputs
                      + 2 * 4 * TM * OUT_W                 # double-buffered output slab
                      + 4 * TM * (BA + max(Dff, OUT_W) + D))  # in-kernel intermediates
    vmem_limit = int(min(48 << 20, max(8 << 20, 4 * (bytes_resident + bytes_per_tile))))

    out_slab = pl.pallas_call(
        functools.partial(main_block_kernel, vocab=V),
        out_shape=jax.ShapeDtypeStruct((BN_pad, OUT_W), f32),
        grid_spec=pltpu.PrefetchScalarGridSpec(
            num_scalar_prefetch=0,
            grid=(n_tiles,),
            in_specs=in_specs,
            out_specs=out_spec),
        compiler_params=pltpu.CompilerParams(
            dimension_semantics=("parallel",),
            vmem_limit_bytes=vmem_limit),
        cost_estimate=cost,
    )(s_na_flat, bid_na, pad_na, s_aa_flat, bid_aa,
      prepped['wq'], prepped['wk'], prepped['wv'], prepped['wo'],
      prepped['w1'], prepped['b1'], prepped['w2'], prepped['b2'],
      prepped['w_out_p'], prepped['b_out_p'])

    log_probs = out_slab[:BN, :V].reshape(B, N_na, V)
    lse = out_slab[:BN, V:V + 1].reshape(B, N_na, 1)
    logits = log_probs + lse                        # exact: logits = log_probs + lse
    return {'logits': logits, 'log_probs': log_probs}


# ----------------------------------------------------------------------------- params
def init_params(key, *, D=32, Dff=64, vocab_na=6, vocab_aa=21, n_ct=4, V=8):
    ks = jax.random.split(key, 14)
    n = lambda k, shape, s=0.05: s * jax.random.normal(k, shape, jnp.float32)
    return {
        'embed_na': n(ks[0], (vocab_na, D), 1.0),
        'embed_aa': n(ks[1], (vocab_aa, D), 1.0),
        'embed_ct': n(ks[2], (n_ct, D), 1.0),
        'w_t':     n(ks[3], (3, D)),
        'wq':      n(ks[4], (D, D)),
        'wk':      n(ks[5], (D, D)),
        'wv':      n(ks[6], (D, D)),
        'wo':      n(ks[7], (D, D)),
        'w1':      n(ks[8], (D, Dff)),
        'b1':      jnp.zeros((1, Dff), jnp.float32),
        'w2':      n(ks[9], (Dff, D)),
        'b2':      jnp.zeros((1, D), jnp.float32),
        'w_out':   n(ks[10], (D, V)),
        'b_out':   jnp.zeros((1, V), jnp.float32),
    }


# ----------------------------------------------------------------------------- main
if __name__ == "__main__":
    B, N_na, N_aa = 2, 16, 8
    key = jax.random.PRNGKey(0)
    pkey, dkey = jax.random.split(key)
    params = init_params(pkey)
    prepped = prepare_params(params)          # one-time packing (hoisted out of forward)

    k1, k2, k3, k4 = jax.random.split(dkey, 4)
    input_feats = {
        'tidx_na': jax.random.randint(k1, (B, N_na), 0, 6),
        'ridx_aa': jax.random.randint(k2, (B, N_aa), 0, 21),
        'ct_na':   jax.random.randint(k3, (B, N_na), 0, 4),
        'T_aa':    jax.random.normal(k4, (B, N_aa, 3), jnp.float32),
        'pad_na':  jnp.concatenate(
            [jnp.ones((B, N_na - 2), jnp.float32), jnp.zeros((B, 2), jnp.float32)], axis=-1),
        'pad_aa':  jnp.concatenate(
            [jnp.ones((B, N_aa - 1), jnp.float32), jnp.zeros((B, 1), jnp.float32)], axis=-1),
    }

    out = main_network_forward(prepped, input_feats)
    jax.block_until_ready(out)
    assert out['logits'].shape == (B, N_na, 8)
    assert out['log_probs'].shape == (B, N_na, 8)
    # log_softmax sanity: rows of exp(log_probs) sum to 1 (padded logit lanes contribute 0)
    assert jnp.allclose(jnp.exp(out['log_probs']).sum(-1), 1.0, atol=1e-4)
    print("KERNEL_OK")
</pallas_src>

<mosaic_0001>
module attributes {stable_mosaic.version = 11 : i64} {
  func.func @main_block_kernel(%arg0: i32, %arg1: memref<16x32xbf16, #tpu.memory_space<vmem>>, %arg2: memref<16x1xi32, #tpu.memory_space<vmem>>, %arg3: memref<16x1xf32, #tpu.memory_space<vmem>>, %arg4: memref<16x32xbf16, #tpu.memory_space<vmem>>, %arg5: memref<1x16xi32, #tpu.memory_space<vmem>>, %arg6: memref<32x32xbf16, #tpu.memory_space<vmem>>, %arg7: memref<32x32xbf16, #tpu.memory_space<vmem>>, %arg8: memref<32x32xbf16, #tpu.memory_space<vmem>>, %arg9: memref<32x32xbf16, #tpu.memory_space<vmem>>, %arg10: memref<32x64xbf16, #tpu.memory_space<vmem>>, %arg11: memref<1x64xf32, #tpu.memory_space<vmem>>, %arg12: memref<64x32xbf16, #tpu.memory_space<vmem>>, %arg13: memref<1x32xf32, #tpu.memory_space<vmem>>, %arg14: memref<32x128xbf16, #tpu.memory_space<vmem>>, %arg15: memref<1x128xf32, #tpu.memory_space<vmem>>, %arg16: memref<16x128xf32, #tpu.memory_space<vmem>>) attributes {dimension_semantics = [#tpu.dimension_semantics<parallel>], iteration_bounds = array<i64: 2>, scalar_prefetch = 0 : i64, scratch_operands = 0 : i64, tpu.core_type = #tpu.core_type<tc>, window_params = [{transform_indices = @transform_0, window_bounds = array<i64: 16, 32>}, {transform_indices = @transform_1, window_bounds = array<i64: 16, 1>}, {transform_indices = @transform_2, window_bounds = array<i64: 16, 1>}, {pipeline_mode = #tpu.pipeline_mode<synchronous>, transform_indices = @transform_3, window_bounds = array<i64: 16, 32>}, {pipeline_mode = #tpu.pipeline_mode<synchronous>, transform_indices = @transform_4, window_bounds = array<i64: 1, 16>}, {pipeline_mode = #tpu.pipeline_mode<synchronous>, transform_indices = @transform_5, window_bounds = array<i64: 32, 32>}, {pipeline_mode = #tpu.pipeline_mode<synchronous>, transform_indices = @transform_6, window_bounds = array<i64: 32, 32>}, {pipeline_mode = #tpu.pipeline_mode<synchronous>, transform_indices = @transform_7, window_bounds = array<i64: 32, 32>}, {pipeline_mode = #tpu.pipeline_mode<synchronous>, transform_indices = @transform_8, window_bounds = array<i64: 32, 32>}, {pipeline_mode = #tpu.pipeline_mode<synchronous>, transform_indices = @transform_9, window_bounds = array<i64: 32, 64>}, {pipeline_mode = #tpu.pipeline_mode<synchronous>, transform_indices = @transform_10, window_bounds = array<i64: 1, 64>}, {pipeline_mode = #tpu.pipeline_mode<synchronous>, transform_indices = @transform_11, window_bounds = array<i64: 64, 32>}, {pipeline_mode = #tpu.pipeline_mode<synchronous>, transform_indices = @transform_12, window_bounds = array<i64: 1, 32>}, {pipeline_mode = #tpu.pipeline_mode<synchronous>, transform_indices = @transform_13, window_bounds = array<i64: 32, 128>}, {pipeline_mode = #tpu.pipeline_mode<synchronous>, transform_indices = @transform_14, window_bounds = array<i64: 1, 128>}, {transform_indices = @transform_15, window_bounds = array<i64: 16, 128>}]} {
    %c0 = arith.constant 0 : index
    %c0_0 = arith.constant 0 : index
    %0 = vector.load %arg1[%c0, %c0_0] : memref<16x32xbf16, #tpu.memory_space<vmem>>, vector<16x32xbf16>
    %c0_1 = arith.constant 0 : index
    %c0_2 = arith.constant 0 : index
    %1 = vector.load %arg4[%c0_1, %c0_2] : memref<16x32xbf16, #tpu.memory_space<vmem>>, vector<16x32xbf16>
    %c0_3 = arith.constant 0 : index
    %c0_4 = arith.constant 0 : index
    %2 = vector.load %arg6[%c0_3, %c0_4] : memref<32x32xbf16, #tpu.memory_space<vmem>>, vector<32x32xbf16>
    %cst = arith.constant dense<0.000000e+00> : vector<16x32xf32>
    %3 = tpu.matmul %0, %2, %cst {dimension_numbers = #tpu.dot_dimension_numbers<[1], [0], [0], [1], [0, 0, 1, 1], [], []>} : vector<16x32xbf16>, vector<32x32xbf16>, vector<16x32xf32> -> vector<16x32xf32>
    %c0_5 = arith.constant 0 : index
    %c0_6 = arith.constant 0 : index
    %4 = vector.load %arg7[%c0_5, %c0_6] : memref<32x32xbf16, #tpu.memory_space<vmem>>, vector<32x32xbf16>
    %cst_7 = arith.constant dense<0.000000e+00> : vector<16x32xf32>
    %5 = tpu.matmul %1, %4, %cst_7 {dimension_numbers = #tpu.dot_dimension_numbers<[1], [0], [0], [1], [0, 0, 1, 1], [], []>} : vector<16x32xbf16>, vector<32x32xbf16>, vector<16x32xf32> -> vector<16x32xf32>
    %c0_8 = arith.constant 0 : index
    %c0_9 = arith.constant 0 : index
    %6 = vector.load %arg8[%c0_8, %c0_9] : memref<32x32xbf16, #tpu.memory_space<vmem>>, vector<32x32xbf16>
    %cst_10 = arith.constant dense<0.000000e+00> : vector<16x32xf32>
    %7 = tpu.matmul %1, %6, %cst_10 {dimension_numbers = #tpu.dot_dimension_numbers<[1], [0], [0], [1], [0, 0, 1, 1], [], []>} : vector<16x32xbf16>, vector<32x32xbf16>, vector<16x32xf32> -> vector<16x32xf32>
    %8 = arith.truncf %3 : vector<16x32xf32> to vector<16x32xbf16>
    %9 = arith.truncf %5 : vector<16x32xf32> to vector<16x32xbf16>
    %cst_11 = arith.constant dense<0.000000e+00> : vector<16x16xf32>
    %10 = tpu.matmul %8, %9, %cst_11 {dimension_numbers = #tpu.dot_dimension_numbers<[1], [1], [0], [0], [0, 0, 1, 0], [], []>} : vector<16x32xbf16>, vector<16x32xbf16>, vector<16x16xf32> -> vector<16x16xf32>
    %c0_12 = arith.constant 0 : index
    %c0_13 = arith.constant 0 : index
    %11 = vector.load %arg2[%c0_12, %c0_13] : memref<16x1xi32, #tpu.memory_space<vmem>>, vector<16x1xi32>
    %c0_14 = arith.constant 0 : index
    %c0_15 = arith.constant 0 : index
    %12 = vector.load %arg5[%c0_14, %c0_15] : memref<1x16xi32, #tpu.memory_space<vmem>>, vector<1x16xi32>
    %13 = vector.broadcast %11 : vector<16x1xi32> to vector<16x16xi32>
    %14 = vector.broadcast %12 : vector<1x16xi32> to vector<16x16xi32>
    %15 = arith.cmpi eq, %13, %14 : vector<16x16xi32>
    %cst_16 = arith.constant -1.000000e+09 : f32
    %16 = vector.broadcast %cst_16 : f32 to vector<16x16xf32>
    %17 = arith.select %15, %10, %16 : vector<16x16xi1>, vector<16x16xf32>
    %cst_17 = arith.constant dense<0xFF800000> : vector<16xf32>
    %18 = vector.multi_reduction <maximumf>, %17, %cst_17 [1] : vector<16x16xf32> to vector<16xf32>
    %19 = vector.shape_cast %18 : vector<16xf32> to vector<16x1xf32>
    %20 = vector.broadcast %19 : vector<16x1xf32> to vector<16x16xf32>
    %21 = arith.subf %17, %20 : vector<16x16xf32>
    %22 = math.exp %21 : vector<16x16xf32>
    %cst_18 = arith.constant dense<0.000000e+00> : vector<16xf32>
    %23 = vector.multi_reduction <add>, %22, %cst_18 [1] : vector<16x16xf32> to vector<16xf32>
    %24 = vector.shape_cast %23 : vector<16xf32> to vector<16x1xf32>
    %cst_19 = arith.constant 1.000000e-30 : f32
    %25 = vector.broadcast %cst_19 : f32 to vector<16x1xf32>
    %26 = arith.maximumf %24, %25 : vector<16x1xf32>
    %27 = arith.truncf %22 : vector<16x16xf32> to vector<16x16xbf16>
    %28 = arith.truncf %7 : vector<16x32xf32> to vector<16x32xbf16>
    %cst_20 = arith.constant dense<0.000000e+00> : vector<16x32xf32>
    %29 = tpu.matmul %27, %28, %cst_20 {dimension_numbers = #tpu.dot_dimension_numbers<[1], [0], [0], [1], [0, 0, 1, 1], [], []>} : vector<16x16xbf16>, vector<16x32xbf16>, vector<16x32xf32> -> vector<16x32xf32>
    %30 = tpu.reciprocal %26 {approx = true} : vector<16x1xf32> -> vector<16x1xf32>
    %31 = vector.broadcast %30 : vector<16x1xf32> to vector<16x32xf32>
    %32 = arith.mulf %29, %31 : vector<16x32xf32>
    %33 = arith.extf %0 : vector<16x32xbf16> to vector<16x32xf32>
    %34 = arith.truncf %32 : vector<16x32xf32> to vector<16x32xbf16>
    %c0_21 = arith.constant 0 : index
    %c0_22 = arith.constant 0 : index
    %35 = vector.load %arg9[%c0_21, %c0_22] : memref<32x32xbf16, #tpu.memory_space<vmem>>, vector<32x32xbf16>
    %cst_23 = arith.constant dense<0.000000e+00> : vector<16x32xf32>
    %36 = tpu.matmul %34, %35, %cst_23 {dimension_numbers = #tpu.dot_dimension_numbers<[1], [0], [0], [1], [0, 0, 1, 1], [], []>} : vector<16x32xbf16>, vector<32x32xbf16>, vector<16x32xf32> -> vector<16x32xf32>
    %37 = arith.addf %33, %36 : vector<16x32xf32>
    %38 = arith.truncf %37 : vector<16x32xf32> to vector<16x32xbf16>
    %c0_24 = arith.constant 0 : index
    %c0_25 = arith.constant 0 : index
    %39 = vector.load %arg10[%c0_24, %c0_25] : memref<32x64xbf16, #tpu.memory_space<vmem>>, vector<32x64xbf16>
    %cst_26 = arith.constant dense<0.000000e+00> : vector<16x64xf32>
    %40 = tpu.matmul %38, %39, %cst_26 {dimension_numbers = #tpu.dot_dimension_numbers<[1], [0], [0], [1], [0, 0, 1, 1], [], []>} : vector<16x32xbf16>, vector<32x64xbf16>, vector<16x64xf32> -> vector<16x64xf32>
    %c0_27 = arith.constant 0 : index
    %c0_28 = arith.constant 0 : index
    %41 = vector.load %arg11[%c0_27, %c0_28] : memref<1x64xf32, #tpu.memory_space<vmem>>, vector<1x64xf32>
    %42 = vector.broadcast %41 : vector<1x64xf32> to vector<16x64xf32>
    %43 = arith.addf %40, %42 : vector<16x64xf32>
    %44 = arith.mulf %43, %43 : vector<16x64xf32>
    %45 = arith.mulf %43, %44 : vector<16x64xf32>
    %cst_29 = arith.constant 4.471500e-02 : f32
    %46 = vector.broadcast %cst_29 : f32 to vector<16x64xf32>
    %47 = arith.mulf %46, %45 : vector<16x64xf32>
    %48 = arith.addf %43, %47 : vector<16x64xf32>
    %cst_30 = arith.constant 0.797884583 : f32
    %49 = vector.broadcast %cst_30 : f32 to vector<16x64xf32>
    %50 = arith.mulf %49, %48 : vector<16x64xf32>
    %51 = math.tanh %50 : vector<16x64xf32>
    %cst_31 = arith.constant 1.000000e+00 : f32
    %52 = vector.broadcast %cst_31 : f32 to vector<16x64xf32>
    %53 = arith.addf %52, %51 : vector<16x64xf32>
    %cst_32 = arith.constant 5.000000e-01 : f32
    %54 = vector.broadcast %cst_32 : f32 to vector<16x64xf32>
    %55 = arith.mulf %54, %53 : vector<16x64xf32>
    %56 = arith.mulf %43, %55 : vector<16x64xf32>
    %57 = arith.truncf %56 : vector<16x64xf32> to vector<16x64xbf16>
    %c0_33 = arith.constant 0 : index
    %c0_34 = arith.constant 0 : index
    %58 = vector.load %arg12[%c0_33, %c0_34] : memref<64x32xbf16, #tpu.memory_space<vmem>>, vector<64x32xbf16>
    %cst_35 = arith.constant dense<0.000000e+00> : vector<16x32xf32>
    %59 = tpu.matmul %57, %58, %cst_35 {dimension_numbers = #tpu.dot_dimension_numbers<[1], [0], [0], [1], [0, 0, 1, 1], [], []>} : vector<16x64xbf16>, vector<64x32xbf16>, vector<16x32xf32> -> vector<16x32xf32>
    %c0_36 = arith.constant 0 : index
    %c0_37 = arith.constant 0 : index
    %60 = vector.load %arg13[%c0_36, %c0_37] : memref<1x32xf32, #tpu.memory_space<vmem>>, vector<1x32xf32>
    %61 = vector.broadcast %60 : vector<1x32xf32> to vector<16x32xf32>
    %62 = arith.addf %59, %61 : vector<16x32xf32>
    %63 = arith.addf %37, %62 : vector<16x32xf32>
    %c0_38 = arith.constant 0 : index
    %c0_39 = arith.constant 0 : index
    %64 = vector.load %arg3[%c0_38, %c0_39] : memref<16x1xf32, #tpu.memory_space<vmem>>, vector<16x1xf32>
    %65 = vector.broadcast %64 : vector<16x1xf32> to vector<16x32xf32>
    %66 = arith.mulf %63, %65 : vector<16x32xf32>
    %67 = arith.truncf %66 : vector<16x32xf32> to vector<16x32xbf16>
    %c0_40 = arith.constant 0 : index
    %c0_41 = arith.constant 0 : index
    %68 = vector.load %arg14[%c0_40, %c0_41] : memref<32x128xbf16, #tpu.memory_space<vmem>>, vector<32x128xbf16>
    %cst_42 = arith.constant dense<0.000000e+00> : vector<16x128xf32>
    %69 = tpu.matmul %67, %68, %cst_42 {dimension_numbers = #tpu.dot_dimension_numbers<[1], [0], [0], [1], [0, 0, 1, 1], [], []>} : vector<16x32xbf16>, vector<32x128xbf16>, vector<16x128xf32> -> vector<16x128xf32>
    %c0_43 = arith.constant 0 : index
    %c0_44 = arith.constant 0 : index
    %70 = vector.load %arg15[%c0_43, %c0_44] : memref<1x128xf32, #tpu.memory_space<vmem>>, vector<1x128xf32>
    %71 = vector.broadcast %70 : vector<1x128xf32> to vector<16x128xf32>
    %72 = arith.addf %69, %71 : vector<16x128xf32>
    %cst_45 = arith.constant dense<0xFF800000> : vector<16xf32>
    %73 = vector.multi_reduction <maximumf>, %72, %cst_45 [1] : vector<16x128xf32> to vector<16xf32>
    %74 = vector.shape_cast %73 : vector<16xf32> to vector<16x1xf32>
    %75 = vector.broadcast %74 : vector<16x1xf32> to vector<16x128xf32>
    %76 = arith.subf %72, %75 : vector<16x128xf32>
    %77 = math.exp %76 : vector<16x128xf32>
    %cst_46 = arith.constant dense<0.000000e+00> : vector<16xf32>
    %78 = vector.multi_reduction <add>, %77, %cst_46 [1] : vector<16x128xf32> to vector<16xf32>
    %79 = vector.shape_cast %78 : vector<16xf32> to vector<16x1xf32>
    %80 = math.log %79 : vector<16x1xf32>
    %81 = arith.addf %80, %74 : vector<16x1xf32>
    %82 = vector.broadcast %81 : vector<16x1xf32> to vector<16x128xf32>
    %83 = arith.subf %72, %82 : vector<16x128xf32>
    %84 = tpu.iota {dimensions = array<i32: 1>} : vector<16x128xi32>
    %c8_i32 = arith.constant 8 : i32
    %85 = vector.broadcast %c8_i32 : i32 to vector<16x128xi32>
    %86 = arith.cmpi eq, %84, %85 : vector<16x128xi32>
    %87 = vector.shape_cast %81 : vector<16x1xf32> to vector<16x1xf32>
    %88 = vector.broadcast %87 : vector<16x1xf32> to vector<16x128xf32>
    %89 = arith.select %86, %88, %83 : vector<16x128xi1>, vector<16x128xf32>
    %c0_47 = arith.constant 0 : index
    %c0_48 = arith.constant 0 : index
    %90 = vector.load %arg16[%c0_47, %c0_48] : memref<16x128xf32, #tpu.memory_space<vmem>>, vector<16x128xf32>
    tpu.vector_store %arg16[%c0_47, %c0_48], %89 {strides = array<i32>} : memref<16x128xf32, #tpu.memory_space<vmem>>, vector<16x128xf32>,
    return
  }
  func.func @transform_0(%arg0: i32) -> (i32, i32) {
    %c0_i32 = arith.constant 0 : i32
    %c0_i32_0 = arith.constant 0 : i32
    return %arg0, %c0_i32 : i32, i32
  }
  func.func @transform_1(%arg0: i32) -> (i32, i32) {
    %c0_i32 = arith.constant 0 : i32
    %c0_i32_0 = arith.constant 0 : i32
    return %arg0, %c0_i32 : i32, i32
  }
  func.func @transform_2(%arg0: i32) -> (i32, i32) {
    %c0_i32 = arith.constant 0 : i32
    %c0_i32_0 = arith.constant 0 : i32
    return %arg0, %c0_i32 : i32, i32
  }
  func.func @transform_3(%arg0: i32) -> (i32, i32) {
    %c0_i32 = arith.constant 0 : i32
    %c0_i32_0 = arith.constant 0 : i32
    %c0_i32_1 = arith.constant 0 : i32
    return %c0_i32, %c0_i32_0 : i32, i32
  }
  func.func @transform_4(%arg0: i32) -> (i32, i32) {
    %c0_i32 = arith.constant 0 : i32
    %c0_i32_0 = arith.constant 0 : i32
    %c0_i32_1 = arith.constant 0 : i32
    return %c0_i32, %c0_i32_0 : i32, i32
  }
  func.func @transform_5(%arg0: i32) -> (i32, i32) {
    %c0_i32 = arith.constant 0 : i32
    %c0_i32_0 = arith.constant 0 : i32
    %c0_i32_1 = arith.constant 0 : i32
    return %c0_i32, %c0_i32_0 : i32, i32
  }
  func.func @transform_6(%arg0: i32) -> (i32, i32) {
    %c0_i32 = arith.constant 0 : i32
    %c0_i32_0 = arith.constant 0 : i32
    %c0_i32_1 = arith.constant 0 : i32
    return %c0_i32, %c0_i32_0 : i32, i32
  }
  func.func @transform_7(%arg0: i32) -> (i32, i32) {
    %c0_i32 = arith.constant 0 : i32
    %c0_i32_0 = arith.constant 0 : i32
    %c0_i32_1 = arith.constant 0 : i32
    return %c0_i32, %c0_i32_0 : i32, i32
  }
  func.func @transform_8(%arg0: i32) -> (i32, i32) {
    %c0_i32 = arith.constant 0 : i32
    %c0_i32_0 = arith.constant 0 : i32
    %c0_i32_1 = arith.constant 0 : i32
    return %c0_i32, %c0_i32_0 : i32, i32
  }
  func.func @transform_9(%arg0: i32) -> (i32, i32) {
    %c0_i32 = arith.constant 0 : i32
    %c0_i32_0 = arith.constant 0 : i32
    %c0_i32_1 = arith.constant 0 : i32
    return %c0_i32, %c0_i32_0 : i32, i32
  }
  func.func @transform_10(%arg0: i32) -> (i32, i32) {
    %c0_i32 = arith.constant 0 : i32
    %c0_i32_0 = arith.constant 0 : i32
    %c0_i32_1 = arith.constant 0 : i32
    return %c0_i32, %c0_i32_0 : i32, i32
  }
  func.func @transform_11(%arg0: i32) -> (i32, i32) {
    %c0_i32 = arith.constant 0 : i32
    %c0_i32_0 = arith.constant 0 : i32
    %c0_i32_1 = arith.constant 0 : i32
    return %c0_i32, %c0_i32_0 : i32, i32
  }
  func.func @transform_12(%arg0: i32) -> (i32, i32) {
    %c0_i32 = arith.constant 0 : i32
    %c0_i32_0 = arith.constant 0 : i32
    %c0_i32_1 = arith.constant 0 : i32
    return %c0_i32, %c0_i32_0 : i32, i32
  }
  func.func @transform_13(%arg0: i32) -> (i32, i32) {
    %c0_i32 = arith.constant 0 : i32
    %c0_i32_0 = arith.constant 0 : i32
    %c0_i32_1 = arith.constant 0 : i32
    return %c0_i32, %c0_i32_0 : i32, i32
  }
  func.func @transform_14(%arg0: i32) -> (i32, i32) {
    %c0_i32 = arith.constant 0 : i32
    %c0_i32_0 = arith.constant 0 : i32
    %c0_i32_1 = arith.constant 0 : i32
    return %c0_i32, %c0_i32_0 : i32, i32
  }
  func.func @transform_15(%arg0: i32) -> (i32, i32) {
    %c0_i32 = arith.constant 0 : i32
    %c0_i32_0 = arith.constant 0 : i32
    return %arg0, %c0_i32 : i32, i32
  }
}

</mosaic_0001>

<bundles_post_ra>
// kernel: tpu_custom_call.1
= control target key start
LH: loop header
LB: loop body
LE: loop exit
PB: predicated region body
PF: predicated region fallthrough
CT: control target
= control target key end

     0   :  { %20 = vsyncpa [#allocation3], 0  ;;  %s2115_s0 = inlined_call_operand.vmem [shape: bf16[32,32], index: 0, kind: input, shape index: {}]   ;;  %s2116_s1 = inlined_call_operand.vmem [shape: s32[32,1], index: 1, kind: input, shape index: {}]   ;;  %s2117_s2 = inlined_call_operand.vmem [shape: f32[32,1], index: 2, kind: input, shape index: {}]   ;;  %s2118_s3 = inlined_call_operand.hbm [shape: bf16[16,32], index: 3, kind: input, shape index: {}]   ;;  %s2119_s4 = inlined_call_operand.hbm [shape: s32[1,16], index: 4, kind: input, shape index: {}]   ;;  %s2120_s5 = inlined_call_operand.vmem [shape: bf16[32,32], index: 5, kind: input, shape index: {}]   ;;  %s2121_s6 = inlined_call_operand.vmem [shape: bf16[32,32], index: 6, kind: input, shape index: {}]   ;;  %s2122_s7 = inlined_call_operand.vmem [shape: bf16[32,32], index: 7, kind: input, shape index: {}]   ;;  %s2123_s8 = inlined_call_operand.vmem [shape: bf16[32,32], index: 8, kind: input, shape index: {}]   ;;  %s2124_s9 = inlined_call_operand.vmem [shape: bf16[32,64], index: 9, kind: input, shape index: {}]   ;;  %s2125_s10 = inlined_call_operand.vmem [shape: f32[1,64], index: 10, kind: input, shape index: {}]   ;;  %s2126_s11 = inlined_call_operand.vmem [shape: bf16[64,32], index: 11, kind: input, shape index: {}]   ;;  %s2127_s12 = inlined_call_operand.vmem [shape: f32[1,32], index: 12, kind: input, shape index: {}]   ;;  %s2128_s13 = inlined_call_operand.vmem [shape: bf16[32,128], index: 13, kind: input, shape index: {}]   ;;  %s2129_s14 = inlined_call_operand.vmem [shape: f32[1,128], index: 14, kind: input, shape index: {}]   ;;  %s2130_s15 = inlined_call_operand.hbm [shape: f32[32,128], index: 15, kind: output, shape index: {}]  }
   0x1   :  { %21 = vsyncpa [#allocation6], 0 }
   0x2   :  { %22 = vsyncpa [#allocation4], 0 }
   0x3   :  { %24 = vsyncpa [#allocation4 + $0x1], 0  ;;  %s1840_s18 = smov 0   ;;  %s1842_s19 = smov 0  }
   0x4   :  { %s1844_s20 = smov 0   ;;  %s1846_s21 = smov 0  }
   0x5 LB: > { %2138 = sst [smem:[#allocation11_spill]] %s1736_s18  ;;  %s1861_s22 = sadd.s32 4294967295, %s1748_s21   ;;  %s1748_s21 = sphi %s1846_s21, %s2155_s21   ;;  %s1744_s20 = sphi %s1844_s20, %s2157_s20   ;;  %s1740_s19 = sphi %s1842_s19, %s2159_s19   ;;  %s1736_s18 = sphi %s1840_s18, %s2158_s18  }
   0x6   : > { %2139 = sst [smem:[#allocation12_spill]] %s1744_s20  ;;  %s1369_s23 = sadd.s32 4294967294, %s1748_s21  }
   0x7   : > { %2140 = sst [smem:[#allocation13_spill]] %s1748_s21  ;;  %s1865_s24 = sadd.s32 1, %s1748_s21  }
   0x8   : > { %2141 = sst [smem:[#allocation14_spill]] %s1865_s24  ;;  %s367_s25 = sadd.s32 1, %s1744_s20 }
   0x9   : > { %s364_s26 = ssub.s32 %s1748_s21, %s1865_s24  ;;  %p377_p0 = scmp.ne.s32.totalorder %s1744_s20, %s1740_s19 }
   0xa   : > { %p365_p1 = scmp.eq.s32.totalorder %s364_s26, 0  ;;  %p378_p2 = scmp.eq.s32.totalorder %s1861_s22, 1 }
   0xb   : > { %p383_p3 = scmp.ne.s32.totalorder %s1740_s19, %s1736_s18  ;;  %p384_p4 = scmp.eq.s32.totalorder %s1369_s23, 1 }
   0xc   : > { %s1876_s27 = scalar_select %p365_p1, %s1744_s20, %s367_s25  }
   0xd   : > { %p1878_p5 = por %p378_p2, %p377_p0  ;;  %p1882_p6 = por %p384_p4, %p383_p3 }
   0xe   : > { %2142 = sst [smem:[#allocation15_spill]] %s1876_s27  ;;  %p1370_p7 = scmp.ge.s32.totalorder %s1748_s21, 1 }
   0xf   : > { %s2144_s29 = scalar_select %p1882_p6, 1, 0 }
  0x10   : > { %p391_p8 = scmp.lt.s32.totalorder %s1748_s21, 3  ;;  %p2136_p9 = scmp.eq.s32.totalorder %s1861_s22, 0 }
  0x11   : > { %2145 = sst [smem:[#allocation16_spill]] %s2144_s29  ;;  %s1750_s16 = smov [#allocation2]  }
  0x12   : > { %p1889_p10 = pnand %p1370_p7, %p391_p8  ;;  %s403_s17 = sshll.u32 %s1750_s16, 4  ;;  %s404_s17 = int_to_ptr.vmem [resolvable:$true] %s403_s17 }
  0x13   : > { %s1751_s25 = smov [#allocation5]   ;;  %s1639_s27 = scalar_lea.vmem %s404_s17, 128 }
  0x14   : > { %p1530_p11 = pneg %p1889_p10  ;;  %s417_s26 = sshll.u32 %s1751_s25, 4  ;;  %s418_s26 = int_to_ptr.vmem [resolvable:$true] %s417_s26 }
  0x15   : > { %p1640_p0 = scmp.ne.s32.totalorder %s404_s17, %s1639_s27  ;;  %p1647_p3 = scmp.lt.s32.totalorder %s404_s17, %s404_s17 }
  0x16   : > { %p1897_p12 = pnand %p2136_p9, %p1530_p11  ;;  %p1648_p4 = scmp.lt.s32.totalorder %s1639_s27, %s1639_s27 }
  0x18   : > { %p1630_p13 = pneg %p1897_p12  ;;  %p1649_p7 = por %p1648_p4, %p1647_p3 }
  0x1a   : > { %p1642_p1 = pnand %p1640_p0, %p1630_p13 }
  0x1c   : > { %p1643_p2 = pneg %p1642_p1 }
  0x1e   : > { %p1650_p8 = pnand %p1649_p7, %p1643_p2 }
  0x20   : > { %1653 = shalt.err (!%p1650_p8)
}
  0x21   : > { %s1752_s16 = smov 64   ;;  %s1753_s20 = smov 4  }
  0x22   : > { %1533 = dma.hbm_to_vmem [thread:$0]  (!%p1897_p12), %s2118_s3, 128, %s404_s17, [#allocation3], %s1752_s16, %s1752_s16, %s1753_s20  }
  0x23   : > { %s1665_s29 = scalar_lea.vmem %s418_s26, 16  ;;  %s1672_s18 = scalar_lea.vmem %s418_s26, 32 }
  0x24   : > { %p1666_p11 = scmp.ne.s32.totalorder %s418_s26, %s1665_s29  ;;  %p1673_p9 = scmp.lt.s32.totalorder %s418_s26, %s418_s26 }
  0x25   : > { %p1674_p3 = scmp.lt.s32.totalorder %s1672_s18, %s1665_s29 }
  0x26   : > { %p1668_p0 = pnand %p1666_p11, %p1630_p13 }
  0x27   : > { %p1675_p2 = por %p1674_p3, %p1673_p9 }
  0x28   : > { %p1669_p1 = pneg %p1668_p0 }
  0x2a   : > { %p1676_p4 = pnand %p1675_p2, %p1669_p1 }
  0x2c   : > { %1679 = shalt.err (!%p1676_p4)
}
  0x2d   : > { %1536 = dma.hbm_to_vmem [thread:$0]  (!%p1897_p12), %s2119_s4, 16, %s418_s26, [#allocation6]  }
  0x2e   : > { %487 = sbr.rel (%p1889_p10) target bundleno = 1995 (0x7cb), region = 80  ;;  %p2148_p7 = scmp.eq.s32.totalorder (!%p1889_p10), %s1861_s22, 0 }
  0x33   : > { %1723 = dma.done.wait (%p2148_p7), [#allocation3], 128   ;;  %p2149_p13 = pmov %p2148_p7 }
  0x34   : > { %p2150_p8 = pmov %p2148_p7 }
  0x35   : > { %1725 = vsyncadd (%p2149_p13), [#allocation3], 4294967168 }
  0x36   : > { %1727 = dma.done.wait (%p2150_p8), [#allocation6], 16   ;;  %p2151_p9 = pmov %p2148_p7 }
  0x37   : > { %s1378_s18 = sshll.u32 %s1861_s22, 1  ;;  %v1754_v0 = vmov 0.0   ;;  %vm1755_vm0 = vmmov 0   ;;  %v1589_v1 = vld [vmem:[%s2121_s6 + $0x8] sm:$0xff]   ;;  %v1591_v3 = vld [vmem:[%s2121_s6] sm:$0xff]   ;;  %vm594_vm1 = vcmask 261120  }
  0x38   : > { %1729 = vsyncadd (%p2151_p9), [#allocation6], 4294967280  ;;  %1456 = vmatprep.subr.bf16.mxu1 %v1754_v0  ;;  %1448 = vmatprep.subr.bf16.mxu0 %v1754_v0  ;;  %p550_p10 = scmp.lt.s32.totalorder %s1378_s18, 3  ;;  %v1590_v2 = vld [vmem:[%s2120_s5 + $0x8] sm:$0xff]   ;;  %v1592_v4 = vld [vmem:[%s2120_s5] sm:$0xff]   ;;  %v1756_v8 = vmov 0  }
  0x39   : > { %1460 = vmatprep.mubr.msk.bf16.mxu1 %vm1755_vm0, %v1754_v0  ;;  %1452 = vmatprep.mubr.msk.bf16.mxu0 %vm1755_vm0, %v1754_v0  ;;  %v1593_v5 = vld [vmem:[#allocation2] sm:$0xff]   ;;  %v1595_v7 = vld [vmem:[%s2122_s7 + $0x8] sm:$0xff]   ;;  %vm827_vm3 = vcmask 130048   ;;  %vm1089_vm5 = vcmask 523264   ;;  %s1420_s16 = sshll.u32 %s1861_s22, 8  ;;  %s1757_s29 = smov [#allocation7]  }
  0x3a   : > { %s2161_s18 = smov (!%p550_p10, %s1378_s18), 3  ;;  %1457 = vmatpush3.bf16.msra.mxu1 %v1589_v1  ;;  %1449 = vmatpush3.bf16.msra.mxu0 %v1590_v2  ;;  %v1596_v10 = vld [vmem:[%s2122_s7] sm:$0xff]   ;;  %v1396_v23 = vld [vmem:[#allocation5] ss:$0 sm:$0xff]  ;;  %s2071_s21 = scalar_lea.hbm %s2130_s15, %s1420_s16 }
  0x3b   : > { %s1379_s20 = sshll.u32 %s2161_s18, 2  ;;  %1458 = vmatprep.subr.bf16.mxu1 %v1754_v0  ;;  %1450 = vmatprep.subr.bf16.mxu0 %v1754_v0  ;;  %v1597_v50 = vld [vmem:[%s2123_s8 + $0x8] sm:$0xff]   ;;  %v1598_v51 = vld [vmem:[%s2123_s8] sm:$0xff]   ;;  %s1684_s30 = sshll.u32 %s1757_s29, 4  ;;  %s1685_s30 = int_to_ptr.vmem [resolvable:$false] %s1684_s30 }
  0x3c   : > { %s553_s25 = scalar_lea.vmem %s2115_s0, %s1379_s20  ;;  %s1381_s20 = sshll.u32 %s2161_s18, 3  ;;  %1587 = vset.pattern.permute.xlu0 %v1756_v8  ;;  %1588 = vset.pattern.permute.xlu1 %v1756_v8  ;;  %v1599_v2 = vld [vmem:[%s2124_s9 + $0x8] sm:$0xff]  }
  0x3d   : > { %v1956_v6 = vld [vmem:[%s553_s25] sm:$0xff]   ;;  %s559_s23 = scalar_lea.vmem %s2116_s1, %s1381_s20  ;;  %s565_s26 = scalar_lea.vmem %s2117_s2, %s1381_s20 }
  0x3e   : > { %1459 = vmatpush3.bf16.msra.mxu1 %v1591_v3  ;;  %1451 = vmatpush3.bf16.msra.mxu0 %v1592_v4  ;;  %v810_v9 = vld [vmem:[%s559_s23] sm:$0xff]  ;;  %v811_v11 = vld [vmem:[%s559_s23 + $0x8] sm:$0xff]  ;;  %s546_s23 = sand.u32 1, %s1740_s19   ;;  %s1686_s17 = scalar_lea.vmem %s1685_s30, 512 }
  0x3f   : > { %1472 = vmatprep.subr.bf16.mxu1 %v1754_v0  ;;  %1464 = vmatprep.subr.bf16.mxu0 %v1754_v0  ;;  %v1600_v3 = vld [vmem:[%s2124_s9] sm:$0xff]   ;;  %s2075_s24 = scalar_lea.sflag [#allocation4], %s546_s23 }
  0x40   : > { %814 = vperm.xlu0 %1587, %v810_v9  }
  0x41   : > { %1461 = vmatmul.mubr.msk.bf16.vlgmr.msra.gmra.mxu1 %vm594_vm1, %v1593_v5  ;;  %1453 = vmatmul.mubr.msk.bf16.vlgmr.msra.gmra.mxu0 %vm594_vm1, %v1956_v6 }
  0x42   : > { %1474 = vmatprep.mubr.msk.bf16.mxu1 %vm1755_vm0, %v1754_v0  ;;  %1468 = vmatprep.mubr.msk.bf16.mxu0 %vm1755_vm0, %v1754_v0 }
  0x43   : > { %1465 = vmatpush3.bf16.msra.mxu0 %v1595_v7  ;;  %v899_v7 = vunpack.c.h.bf16 %v1956_v6 }
  0x44   : > { %1466 = vmatprep.subr.bf16.mxu0 %v1754_v0  ;;  %817 = vperm.xlu0 %1587, %v811_v11  }
  0x47   : > { %1467 = vmatpush3.bf16.msra.mxu0 %v1596_v10 }
  0x48   : > { %1478 = vmatprep.subr.bf16.mxu0 %v1754_v0 }
  0x4a   : > { %1469 = vmatmul.mubr.msk.bf16.vlgmr.msra.gmra.mxu0 %vm594_vm1, %v1593_v5  ;;  %v898_v5 = vunpack.c.l.bf16 %v1956_v6  ;;  %v1601_v6 = vld [vmem:[%s2126_s11 + $0x18] sm:$0xff]  }
  0x4b   : > { %1480 = vmatprep.mubr.msk.bf16.mxu0 %vm1755_vm0, %v1754_v0 }
  0xbb   : > { %v815_v24 = vpop.permute.xlu0 %814 }
  0xbc   : > { %vm823_vm2 = vcmp.eq.s32.totalorder %v815_v24, %v1396_v23 }
  0xbf   : > { %v818_v26 = vpop.permute.xlu0 %817 }
  0xc0   : > { %vm824_vm4 = vcmp.eq.s32.totalorder %v818_v26, %v1396_v23 }
 0x101   : > { %v697_v12 = vpop.f32.mrf.mxu1  ;;  %v632_v13 = vpop.f32.mrf.mxu0 }
 0x103   : > { %v1462_v14 = vpop.f32.mrf.mxu1  ;;  %v1454_v15 = vpop.f32.mrf.mxu0 }
 0x104   : > { %v1602_v14 = vld [vmem:[%s2126_s11 + $0x10] sm:$0xff]   ;;  %v1603_v15 = vld [vmem:[%s2126_s11 + $0x8] sm:$0xff]  }
 0x105   : > { %v700_v16 = vpop.f32.mrf.mxu1  ;;  %v635_v18 = vpop.f32.mrf.mxu0 }
 0x106   : > { %v762_v17 = vpack.c.bf16 %v700_v16, %v697_v12  ;;  %v761_v22 = vpack.c.bf16 %v635_v18, %v632_v13  ;;  %v1604_v16 = vld [vmem:[%s2126_s11] sm:$0xff]   ;;  %v1137_v18 = vld [vmem:[%s565_s26 + $0x8] sm:$0xff] }
 0x107   : > { %v1463_v19 = vpop.f32.mrf.mxu1  ;;  %v1455_v21 = vpop.f32.mrf.mxu0 }
 0x108   : > { %v767_v20 = vsel %vm594_vm1, %v762_v17, 0  ;;  %v1136_v17 = vld [vmem:[%s565_s26] sm:$0xff]  ;;  %s1377_s26 = sshll.u32 %s546_s23, 4 }
 0x109   : > { %1473 = vmatpush3.bf16.xpose.msra.mxu1 %v767_v20  ;;  %v1401_v19 = vld [vmem:[%s2125_s10] ss:$0 sm:$0xff]  ;;  %s548_s25 = scalar_lea.vmem [#allocation7], %s1377_s26 }
 0x10a   : > { %1484 = vmatprep.subr.bf16.mxu1 %v1754_v0  ;;  %v754_v34 = vpop.f32.mrf.mxu0  ;;  %s1261_s18 = sshll.u32 %s548_s25, 4  ;;  %s2073_s18 = int_to_ptr.vmem [resolvable:$true] %s1261_s18 }
 0x10b   : > { %s1680_s22 = scalar_lea.vmem %s2073_s18, 256  ;;  %p1687_p1 = scmp.lt.s32.totalorder %s2073_s18, %s1685_s30 }
 0x10c   : > { %v1470_v35 = vpop.f32.mrf.mxu0  ;;  %p1681_p12 = scmp.ne.s32.totalorder %s2073_s18, %s1680_s22  ;;  %p1688_p3 = scmp.lt.s32.totalorder %s1686_s17, %s1680_s22 }
 0x10e   : > { %v757_v36 = vpop.f32.mrf.mxu0  ;;  %p1682_p11 = pnand %p1681_p12, %p1878_p5  ;;  %p1689_p2 = por %p1688_p3, %p1687_p1 }
 0x10f   : > { %v849_v37 = vpack.c.bf16 %v757_v36, %v754_v34 }
 0x110   : > { %1475 = vmatmul.mubr.msk.bf16.vlgmr.msra.gmra.mxu1 %vm594_vm1, %v761_v22  ;;  %v1471_v38 = vpop.f32.mrf.mxu0  ;;  %p1683_p0 = pneg %p1682_p11 }
 0x111   : > { %1488 = vmatprep.mubr.msk.bf16.mxu1 %vm1755_vm0, %v1754_v0  ;;  %1479 = vmatpush3.bf16.msra.mxu0 %v849_v37 }
 0x112   : > { %1492 = vmatprep.subr.bf16.mxu0 %v1754_v0  ;;  %1485 = vmatpush3.bf16.msra.mxu1 %v1597_v50  ;;  %p1690_p4 = pnand %p1689_p2, %p1683_p0 }
 0x113   : > { %1486 = vmatprep.subr.bf16.mxu1 %v1754_v0 }
 0x116   : > { %1487 = vmatpush3.bf16.msra.mxu1 %v1598_v51 }
 0x117   : > { %1500 = vmatprep.subr.bf16.mxu1 %v1754_v0 }
 0x1d0   : > { %v803_v25 = vpop.f32.mrf.mxu1 }
 0x1d1   : > { %v825_v27 = vsel %vm823_vm2, %v803_v25, -1e+09 }
 0x1d2   : > { %v1476_v28 = vpop.f32.mrf.mxu1  ;;  %v828_v29 = vsel %vm827_vm3, %v825_v27, -inf }
 0x1d3   : > { %829 = vmax.xlane.f32.xlu1 %v828_v29 }
 0x1d4   : > { %v806_v30 = vpop.f32.mrf.mxu1 }
 0x1d5   : > { %v826_v31 = vsel %vm824_vm4, %v806_v30, -1e+09 }
 0x1d6   : > { %v1477_v32 = vpop.f32.mrf.mxu1  ;;  %v831_v33 = vsel %vm827_vm3, %v826_v31, -inf }
 0x1d7   : > { %832 = vmax.xlane.f32.xlu1 %v831_v33 }
 0x25c   : > { %v830_v39 = vpop.xlane.xlu1 %829 }
 0x25d   : > { %v834_v40 = vsub.f32 %v825_v27, %v830_v39 }
 0x25f   : > { %v836_v41 = vmul.f32 1.442695, %v834_v40 }
 0x260   : > { %v833_v42 = vpop.xlane.xlu1 %832 }
 0x261   : > { %1608 = vpow2.f32 %v836_v41  ;;  %v835_v43 = vsub.f32 %v826_v31, %v833_v42 }
 0x263   : > { %v838_v44 = vmul.f32 1.442695, %v835_v43 }
 0x265   : > { %1610 = vpow2.f32 %v838_v44 }
 0x26e   : > { %v1609_v45 = vpop.eup %1608 }
 0x26f   : > { %v840_v46 = vsel %vm827_vm3, %v1609_v45, 0.0 }
 0x270   : > { %841 = vadd.xlane.f32.xlu0 %v840_v46  ;;  %v1606_v46 = vld [vmem:[%s2128_s13] sm:$0xff]  }
 0x272   : > { %v1611_v47 = vpop.eup %1610 }
 0x273   : > { %v843_v48 = vsel %vm827_vm3, %v1611_v47, 0.0  ;;  %v848_v49 = vpack.c.bf16 %v1611_v47, %v1609_v45  ;;  %v1605_v45 = vld [vmem:[%s2128_s13 + $0x8] sm:$0xff]   ;;  %v1405_v47 = vld [vmem:[%s2127_s12] ss:$0 sm:$0xff] }
 0x274   : > { %844 = vadd.xlane.f32.xlu1 %v843_v48 }
 0x275   : > { %1481 = vmatmul.mubr.msk.bf16.vlgmr.msra.gmra.mxu0 %vm827_vm3, %v848_v49 }
 0x276   : > { %1496 = vmatprep.mubr.msk.bf16.mxu0 %vm1755_vm0, %v1754_v0  ;;  %1493 = vmatpush3.bf16.msra.mxu0 %v1599_v2 }
 0x277   : > { %1494 = vmatprep.subr.bf16.mxu0 %v1754_v0 }
 0x27a   : > { %1495 = vmatpush3.bf16.msra.mxu0 %v1600_v3 }
 0x27b   : > { %1512 = vmatprep.subr.bf16.mxu0 %v1754_v0 }
 0x285   : > { %1140 = vperm.xlu1 %1588, %v1136_v17  }
 0x289   : > { %1145 = vperm.xlu1 %1588, %v1137_v18  }
 0x2f9   : > { %v842_v52 = vpop.xlane.xlu0 %841 }
 0x2fa   : > { %v846_v54 = vmax.f32 %v842_v52, 1e-30 }
 0x2fc   : > { %1612 = vrcp.f32 %v846_v54 }
 0x2fd   : > { %v845_v53 = vpop.xlane.xlu1 %844 }
 0x2fe   : > { %v847_v55 = vmax.f32 %v845_v53, 1e-30 }
 0x300   : > { %1614 = vrcp.f32 %v847_v55 }
 0x301   : > { %v1141_v50 = vpop.permute.xlu1 %1140 }
 0x309   : > { %v1613_v58 = vpop.eup %1612 }
 0x30d   : > { %v1615_v59 = vpop.eup %1614 }
 0x335   : > { %v887_v56 = vpop.f32.mrf.mxu0 }
 0x336   : > { %v896_v61 = vmul.f32 %v1613_v58, %v887_v56  ;;  %v1146_v56 = vpop.permute.xlu1 %1145 }
 0x337   : > { %v1482_v57 = vpop.f32.mrf.mxu0 }
 0x339   : > { %v890_v60 = vpop.f32.mrf.mxu0 }
 0x33a   : > { %v897_v62 = vmul.f32 %v1615_v59, %v890_v60  ;;  %v1411_v60 = vld [vmem:[%s2129_s14] ss:$0 sm:$0xff] }
 0x33b   : > { %v1483_v63 = vpop.f32.mrf.mxu0 }
 0x33c   : > { %v900_v1 = vpack.c.bf16 %v897_v62, %v896_v61 }
 0x33e   : > { %1489 = vmatmul.mubr.msk.bf16.vlgmr.msra.gmra.mxu1 %vm594_vm1, %v900_v1 }
 0x33f   : > { %1508 = vmatprep.mubr.msk.bf16.mxu1 %vm1755_vm0, %v1754_v0  ;;  %1501 = vmatpush3.bf16.msra.mxu1 %v1601_v6 }
 0x340   : > { %1502 = vmatprep.subr.bf16.mxu1 %v1754_v0 }
 0x343   : > { %1503 = vmatpush3.bf16.msra.mxu1 %v1602_v14  ;;  %v1240_v14 = vlaneseq }
 0x344   : > { %1504 = vmatprep.subr.bf16.mxu1 %v1754_v0 }
 0x347   : > { %1505 = vmatpush3.bf16.msra.mxu1 %v1603_v15 }
 0x348   : > { %1506 = vmatprep.subr.bf16.mxu1 %v1754_v0 }
 0x34b   : > { %1507 = vmatpush3.bf16.msra.mxu1 %v1604_v16  ;;  %v1241_v16 = vand.u32 127, %v1240_v14 }
 0x34d   : > { %vm1242_vm6 = vcmp.eq.s32.totalorder %v1241_v16, 8 }
 0x3fe   : > { %v954_v4 = vpop.f32.mrf.mxu1 }
 0x3ff   : > { %v2018_v10 = vadd.f32 %v954_v4, %v898_v5 }
 0x400   : > { %v1490_v8 = vpop.f32.mrf.mxu1 }
 0x402   : > { %v957_v9 = vpop.f32.mrf.mxu1 }
 0x403   : > { %v2020_v11 = vadd.f32 %v957_v9, %v899_v7 }
 0x404   : > { %v1491_v12 = vpop.f32.mrf.mxu1 }
 0x405   : > { %v963_v13 = vpack.c.bf16 %v2020_v11, %v2018_v10 }
 0x407   : > { %1497 = vmatmul.mubr.msk.bf16.vlgmr.msra.gmra.mxu0 %vm594_vm1, %v963_v13 }
 0x408   : > { %1516 = vmatprep.mubr.msk.bf16.mxu0 %vm1755_vm0, %v1754_v0  ;;  %1513 = vmatpush3.bf16.msra.mxu0 %v1605_v45 }
 0x409   : > { %1514 = vmatprep.subr.bf16.mxu0 %v1754_v0 }
 0x40c   : > { %1515 = vmatpush3.bf16.msra.mxu0 %v1606_v46 }
 0x4c7   : > { %v1024_v20 = vpop.f32.mrf.mxu0 }
 0x4c8   : > { %v1025_v21 = vadd.f32 %v1401_v19, %v1024_v20 }
 0x4c9   : > { %v1498_v22 = vpop.f32.mrf.mxu0 }
 0x4ca   : > { %v1031_v23 = vmul.f32 %v1025_v21, %v1025_v21 }
 0x4cb   : > { %v1027_v24 = vpop.f32.mrf.mxu0 }
 0x4cc   : > { %v1033_v25 = vmul.f32 %v1031_v23, %v1025_v21  ;;  %v1028_v26 = vadd.f32 %v1401_v19, %v1027_v24 }
 0x4cd   : > { %v1499_v27 = vpop.f32.mrf.mxu0 }
 0x4ce   : > { %v1035_v28 = vmul.f32 0.044715, %v1033_v25  ;;  %v1032_v29 = vmul.f32 %v1028_v26, %v1028_v26 }
 0x4d0   : > { %v1037_v30 = vadd.f32 %v1035_v28, %v1025_v21  ;;  %v1034_v31 = vmul.f32 %v1032_v29, %v1028_v26 }
 0x4d2   : > { %v1039_v32 = vmul.f32 0.7978846, %v1037_v30  ;;  %v1036_v33 = vmul.f32 0.044715, %v1034_v31 }
 0x4d4   : > { %1616 = vtanh.f32 %v1039_v32  ;;  %v1038_v34 = vadd.f32 %v1036_v33, %v1028_v26 }
 0x4d6   : > { %v1040_v35 = vmul.f32 0.7978846, %v1038_v34 }
 0x4d8   : > { %1618 = vtanh.f32 %v1040_v35 }
 0x4e1   : > { %v1617_v36 = vpop.eup %1616 }
 0x4e2   : > { %v1043_v37 = vadd.f32 1.0, %v1617_v36 }
 0x4e4   : > { %v1045_v39 = vmul.f32 0.5, %v1043_v37 }
 0x4e5   : > { %v1619_v38 = vpop.eup %1618 }
 0x4e6   : > { %v1044_v40 = vadd.f32 1.0, %v1619_v38  ;;  %v1047_v42 = vmul.f32 %v1045_v39, %v1025_v21 }
 0x4e8   : > { %v1046_v41 = vmul.f32 0.5, %v1044_v40 }
 0x4ea   : > { %v1048_v43 = vmul.f32 %v1046_v41, %v1028_v26 }
 0x4ec   : > { %v1049_v44 = vpack.c.bf16 %v1048_v43, %v1047_v42 }
 0x4ee   : > { %1509 = vmatmul.mubr.msk.bf16.vlgmr.msra.gmra.mxu1 %vm1089_vm5, %v1049_v44 }
 0x5ae   : > { %v1127_v48 = vpop.f32.mrf.mxu1 }
 0x5af   : > { %v1128_v49 = vadd.f32 %v1405_v47, %v1127_v48 }
 0x5b0   : > { %v1510_v51 = vpop.f32.mrf.mxu1 }
 0x5b1   : > { %v1134_v53 = vadd.f32 %v1128_v49, %v2018_v10 }
 0x5b2   : > { %v1130_v52 = vpop.f32.mrf.mxu1 }
 0x5b3   : > { %v1131_v54 = vadd.f32 %v1405_v47, %v1130_v52  ;;  %v1148_v57 = vmul.f32 %v1141_v50, %v1134_v53 }
 0x5b4   : > { %v1511_v55 = vpop.f32.mrf.mxu1 }
 0x5b5   : > { %v1135_v0 = vadd.f32 %v1131_v54, %v2020_v11 }
 0x5b7   : > { %v1149_v58 = vmul.f32 %v1146_v56, %v1135_v0 }
 0x5b9   : > { %v1150_v59 = vpack.c.bf16 %v1149_v58, %v1148_v57 }
 0x5bb   : > { %1517 = vmatmul.mubr.msk.bf16.vlgmr.msra.gmra.mxu0 %vm594_vm1, %v1150_v59 }
 0x67b   : > { %v1211_v61 = vpop.f32.mrf.mxu0 }
 0x67c   : > { %v1212_v62 = vadd.f32 %v1411_v60, %v1211_v61 }
 0x67d   : > { %v1518_v63 = vpop.f32.mrf.mxu0 }
 0x67e   : > { %1218 = vmax.xlane.f32.xlu1 %v1212_v62 }
 0x67f   : > { %v1214_v1 = vpop.f32.mrf.mxu0 }
 0x680   : > { %v1215_v2 = vadd.f32 %v1411_v60, %v1214_v1 }
 0x681   : > { %v1519_v3 = vpop.f32.mrf.mxu0 }
 0x682   : > { %1220 = vmax.xlane.f32.xlu0 %v1215_v2 }
 0x707   : > { %v1219_v4 = vpop.xlane.xlu1 %1218 }
 0x708   : > { %v1222_v5 = vsub.f32 %v1212_v62, %v1219_v4 }
 0x70a   : > { %v1224_v7 = vmul.f32 1.442695, %v1222_v5 }
 0x70b   : > { %v1221_v8 = vpop.xlane.xlu0 %1220 }
 0x70c   : > { %1620 = vpow2.f32 %v1224_v7  ;;  %v1223_v9 = vsub.f32 %v1215_v2, %v1221_v8 }
 0x70e   : > { %v1226_v10 = vmul.f32 1.442695, %v1223_v9 }
 0x710   : > { %1622 = vpow2.f32 %v1226_v10 }
 0x719   : > { %v1621_v11 = vpop.eup %1620 }
 0x71a   : > { %1228 = vadd.xlane.f32.xlu0 %v1621_v11 }
 0x71d   : > { %v1623_v12 = vpop.eup %1622 }
 0x71e   : > { %1230 = vadd.xlane.f32.xlu0 %v1623_v12 }
 0x7a3   : > { %v1229_v13 = vpop.xlane.xlu0 %1228 }
 0x7a4   : > { %1624 = vlog2.f32 %v1229_v13 }
 0x7a7   : > { %v1231_v6 = vpop.xlane.xlu0 %1230 }
 0x7a8   : > { %1626 = vlog2.f32 %v1231_v6 }
 0x7b1   : > { %v1625_v15 = vpop.eup %1624 }
 0x7b2   : > { %v1233_v17 = vmul.f32 0.6931472, %v1625_v15 }
 0x7b4   : > { %v1236_v18 = vadd.f32 %v1233_v17, %v1219_v4 }
 0x7b5   : > { %v1627_v19 = vpop.eup %1626 }
 0x7b6   : > { %v1238_v20 = vsub.f32 %v1212_v62, %v1236_v18  ;;  %v1235_v21 = vmul.f32 0.6931472, %v1627_v19 }
 0x7b8   : > { %v1243_v22 = vsel %vm1242_vm6, %v1236_v18, %v1238_v20  ;;  %v1237_v23 = vadd.f32 %v1235_v21, %v1221_v8 }
 0x7b9   : > { %1245 = vst [vmem:[%s548_s25] sm:$0xff] %v1243_v22 }
 0x7ba   : > { %v1239_v24 = vsub.f32 %v1215_v2, %v1237_v23 }
 0x7bc   : > { %v1244_v25 = vsel %vm1242_vm6, %v1237_v23, %v1239_v24 }
 0x7bd   : > { %1246 = vst [vmem:[%s548_s25 + $0x8] sm:$0xff] %v1244_v25 }
 0x7be   : > { %1693 = shalt.err (!%p1690_p4)
}
 0x7bf   : > { %s1694_s23 = scalar_lea.hbm %s2071_s21, 256  ;;  %s1698_s25 = scalar_lea.hbm %s2130_s15, 512 }
 0x7c0   : > { %p1695_p7 = scmp.ne.s32.totalorder %s2071_s21, %s1694_s23  ;;  %p1699_p9 = scmp.lt.s32.totalorder %s2071_s21, %s2130_s15 }
 0x7c1   : > { %p1700_p10 = scmp.lt.s32.totalorder %s1698_s25, %s1694_s23 }
 0x7c2   : > { %p1696_p13 = pnand %p1695_p7, %p1878_p5 }
 0x7c3   : > { %p1701_p12 = por %p1700_p10, %p1699_p9 }
 0x7c4   : > { %p1697_p8 = pneg %p1696_p13 }
 0x7c6   : > { %p1702_p11 = pnand %p1701_p12, %p1697_p8 }
 0x7c8   : > { %1705 = shalt.err (!%p1702_p11)
}
 0x7c9   : > { %s1758_s22 = smov 128   ;;  %s1759_s29 = smov 8  }
 0x7ca   : > { %1528 = dma.vmem_to_hbm [thread:$0]  (%p1878_p5), %s2073_s18, 256, %s2071_s21, %s2075_s24, %s1758_s22, %s1758_s22, %s1759_s29  }
 0x7cb PF: > { %s2152_s30 = sld [smem:[#allocation13_spill]] }
 0x7cc   : > { %s2153_s17 = sld [smem:[#allocation11_spill]] }
 0x7d1   : > { %p1545_p0 = scmp.ge.s32.totalorder %s2152_s30, 2 }
 0x7d2   : > { %s1276_s16 = sand.u32 1, %s2153_s17  }
 0x7d3   : > { %p1538_p1 = pnand %p1545_p0, %p1882_p6  ;;  %s1277_s23 = scalar_lea.sflag [#allocation4], %s1276_s16 }
 0x7d5   : > { %p1539_p3 = pneg %p1538_p1 }
 0x7d7   : > { %1731 = dma.done.wait (%p1539_p3), %s1277_s23, 256  }
 0x7d8   : > { %1733 = vsyncadd (%p1539_p3), %s1277_s23, 4294967040  ;;  %s2155_s21 = sld [smem:[#allocation14_spill]]  ;;  %s2158_s18 = smov %s1740_s19 }
 0x7d9   : > { %s2156_s25 = sld [smem:[#allocation12_spill]] }
 0x7da   : > { %s2157_s20 = sld [smem:[#allocation15_spill]] }
 0x7de   : > { %p27_p2 = scmp.ge.s32.totalorder %s2155_s21, 4  }
 0x7df   : > { %s2159_s19 = smov %s2156_s25 }
 0x7e0   :  { %29 = sbr.rel (!%p27_p2) target bundleno = 5 (0x5), region = 130 }
 0x7e5   :  { %1282 = vsyncpa [#allocation3], 1 }
 0x7e6   :  { %1284 = vsyncpa [#allocation3 + $0x1], 1 }
 0x7e7   :  { %1285 = vsyncpa [#allocation6], 1 }
 0x7e8   :  { %1286 = vsyncpa [#allocation4], 1 }
 0x7e9   :  { %1288 = vsyncpa [#allocation4 + $0x1], 1 }

</bundles_post_ra>
